<compile_context>
chip_gen: v7x
topology: tpu7x:2x2x1
jax: 0.10.0
libtpu: 0.0.40
codegen_flags: <defaults>
</compile_context>

<pallas_src>
from functools import partial

import jax
import jax.numpy as jnp
from jax.experimental import pallas as pl
from jax.experimental.pallas import tpu as pltpu


LANE = 128     # TPU lane width; pad all feature dims to this.
TILE_B = 128   # batch rows per grid step (full MXU LHS tiles).


def dan_kernel(counts_ref, inv_len_ref, emb_ref, w1_ref, b1_ref, w2_ref,
               b2_ref, out_ref):
    # counts_ref : (TB, Vp) bf16  bag-of-words token counts for this tile
    # inv_len_ref: (TB, 1)  f32   1 / text_len (per example)
    # emb_ref    : (Vp, Dp) bf16  embedding table (VMEM-resident)
    # w1_ref     : (Dp, Hp) bf16  b1_ref: (1, Hp) f32
    # w2_ref     : (Hp, Cp) bf16  b2_ref: (1, Cp) f32
    # out_ref    : (TB, Cp) f32
    #
    # Embedding gather + sum-over-L expressed as a matmul (rides the MXU,
    # f32 accumulation).
    sum_emb = jnp.dot(counts_ref[...], emb_ref[...],
                      preferred_element_type=jnp.float32)            # (TB, Dp)
    avg = sum_emb * inv_len_ref[...]                                  # f32
    h = jnp.dot(avg.astype(w1_ref.dtype), w1_ref[...],
                preferred_element_type=jnp.float32) + b1_ref[...]
    h = jnp.maximum(h, 0.0)                                           # ReLU (f32)
    # TODO(synk): nn.Dropout(p=0.5) is identity in eval mode; a training-mode
    # kernel would mask with pltpu.prng_seed / pltpu.prng_random_bits.
    logits = jnp.dot(h.astype(w2_ref.dtype), w2_ref[...],
                     preferred_element_type=jnp.float32) + b2_ref[...]
    out_ref[...] = logits.astype(out_ref.dtype)


def _round_up(x, m):
    return ((x + m - 1) // m) * m


def _pad2d(x, rows, cols):
    return jnp.zeros((rows, cols), x.dtype).at[: x.shape[0], : x.shape[1]].set(x)


@partial(jax.jit, static_argnames=("is_prob",))
def dan_forward(input_text, text_len, emb_table, w1, b1, w2, b2, is_prob=False):
    """DanModel.forward. input_text: (B, L) int32 ids; text_len: (B,)."""
    B, _L = input_text.shape
    V, D = emb_table.shape
    H = w1.shape[1]
    C = w2.shape[1]

    Vp, Dp, Hp, Cp = (_round_up(d, LANE) for d in (V, D, H, C))
    Bp = _round_up(max(B, 1), TILE_B)
    param_dtype = jnp.bfloat16  # MXU-native storage; f32 accumulation in-kernel.

    # Bag-of-words counts: counts[b, v] = #occurrences of token v in row b.
    # Padding token 0 maps to the zeroed embedding row, matching
    # nn.Embedding(padding_idx=0) semantics exactly.
    # TODO(synk): for large vocabularies replace the counts matmul with an
    # in-kernel scalar-prefetch DMA gather of embedding rows (counts would be
    # too large); this path targets small V.
    rows = jnp.arange(B, dtype=jnp.int32)[:, None]
    counts = jnp.zeros((Bp, Vp), jnp.float32)
    counts = counts.at[rows, input_text].add(1.0).astype(param_dtype)

    # Precomputed reciprocal lengths (no divide in the kernel); padded rows = 1.
    # Note: a zero length gives inf, same as the PyTorch module's division.
    inv_len = jnp.ones((Bp, 1), jnp.float32)
    inv_len = inv_len.at[:B, 0].set(1.0 / text_len.astype(jnp.float32))

    # Zero-pad parameters to lane multiples (in production this cast/pad would
    # be done once at parameter-load time, not per forward call).
    emb_p = _pad2d(emb_table.astype(param_dtype), Vp, Dp)
    w1_p = _pad2d(w1.astype(param_dtype), Dp, Hp)
    w2_p = _pad2d(w2.astype(param_dtype), Hp, Cp)
    b1_p = _pad2d(b1.reshape(1, H).astype(jnp.float32), 1, Hp)
    b2_p = _pad2d(b2.reshape(1, C).astype(jnp.float32), 1, Cp)

    grid = (Bp // TILE_B,)
    resident = lambda shape: pl.BlockSpec(shape, lambda i: (0, 0))

    logits_p = pl.pallas_call(
        dan_kernel,
        out_shape=jax.ShapeDtypeStruct((Bp, Cp), jnp.float32),
        grid=grid,
        in_specs=[
            pl.BlockSpec((TILE_B, Vp), lambda i: (i, 0)),   # counts (per tile)
            pl.BlockSpec((TILE_B, 1), lambda i: (i, 0)),    # inv_len (per tile)
            resident((Vp, Dp)),                             # emb table
            resident((Dp, Hp)),                             # w1
            resident((1, Hp)),                              # b1
            resident((Hp, Cp)),                             # w2
            resident((1, Cp)),                              # b2
        ],
        out_specs=pl.BlockSpec((TILE_B, Cp), lambda i: (i, 0)),
        compiler_params=pltpu.CompilerParams(
            dimension_semantics=("parallel",)),
    )(counts, inv_len, emb_p, w1_p, b1_p, w2_p, b2_p)

    logits = logits_p[:B, :C]
    if is_prob:
        logits = jax.nn.softmax(logits, axis=-1)
    return logits


def reference_forward(input_text, text_len, emb_table, w1, b1, w2, b2):
    emb = jnp.take(emb_table, input_text, axis=0)
    avg = jnp.sum(emb, axis=1) / text_len.reshape(-1, 1).astype(jnp.float32)
    h = jnp.maximum(avg @ w1 + b1, 0.0)
    return h @ w2 + b2


if __name__ == "__main__":
    key = jax.random.PRNGKey(0)

    # Small, DAN-consistent shapes.
    n_classes = 10
    vocab_size = 100
    emb_dim = 50
    n_hidden = 50
    batch = 2
    seq = 8

    k_emb, k_w1, k_b1, k_w2, k_b2, k_tok, k_len = jax.random.split(key, 7)

    # Deterministic synthetic parameters (no checkpoint load).
    emb_table = jax.random.normal(k_emb, (vocab_size, emb_dim), dtype=jnp.float32) * 0.1
    emb_table = emb_table.at[0].set(0.0)  # padding_idx=0 row is zero
    w1 = jax.random.normal(k_w1, (emb_dim, n_hidden), dtype=jnp.float32) * 0.1
    b1 = jax.random.normal(k_b1, (n_hidden,), dtype=jnp.float32) * 0.1
    w2 = jax.random.normal(k_w2, (n_hidden, n_classes), dtype=jnp.float32) * 0.1
    b2 = jax.random.normal(k_b2, (n_classes,), dtype=jnp.float32) * 0.1

    # Example inputs: token ids (with trailing padding) and per-example lengths.
    input_text = jax.random.randint(k_tok, (batch, seq), 1, vocab_size, dtype=jnp.int32)
    text_len = jnp.array([seq, seq - 2], dtype=jnp.float32)
    input_text = input_text.at[1, seq - 2:].set(0)  # pad tail of example 1

    logits = dan_forward(input_text, text_len, emb_table, w1, b1, w2, b2)
    logits = jax.block_until_ready(logits)
    assert logits.shape == (batch, n_classes)

    # Reference uses the same bf16-quantized parameters (upcast to f32) so the
    # check isolates kernel correctness from the intentional bf16 storage.
    emb_q = emb_table.astype(jnp.bfloat16).astype(jnp.float32)
    w1_q = w1.astype(jnp.bfloat16).astype(jnp.float32)
    w2_q = w2.astype(jnp.bfloat16).astype(jnp.float32)
    ref = reference_forward(input_text, text_len, emb_q, w1_q, b1, w2_q, b2)
    assert jnp.allclose(logits, ref, atol=1e-2, rtol=1e-2), "mismatch vs reference"

    print("KERNEL_OK")
</pallas_src>

<mosaic_0001>
module attributes {stable_mosaic.version = 11 : i64} {
  func.func private @main(%arg0: i32) attributes {dimension_semantics = [#tpu.dimension_semantics<core_parallel>], iteration_bounds = array<i64: 2>, tpu.core_type = #tpu.core_type<sc_scalar_subcore>, window_params = []} {
    return
  }
}

module attributes {stable_mosaic.version = 11 : i64} {
  func.func private @main(%arg0: i32) attributes {dimension_semantics = [#tpu.dimension_semantics<core_parallel>], iteration_bounds = array<i64: 2>, tpu.core_type = #tpu.core_type<sc_scalar_subcore>, window_params = []} {
    return
  }
}

module attributes {stable_mosaic.version = 11 : i64} {
  func.func @dan_kernel(%arg0: i32, %arg1: memref<128x128xbf16, #tpu.memory_space<vmem>>, %arg2: memref<128x1xf32, #tpu.memory_space<vmem>>, %arg3: memref<128x128xbf16, #tpu.memory_space<vmem>>, %arg4: memref<128x128xbf16, #tpu.memory_space<vmem>>, %arg5: memref<1x128xf32, #tpu.memory_space<vmem>>, %arg6: memref<128x128xbf16, #tpu.memory_space<vmem>>, %arg7: memref<1x128xf32, #tpu.memory_space<vmem>>, %arg8: memref<128x128xf32, #tpu.memory_space<vmem>>) attributes {dimension_semantics = [#tpu.dimension_semantics<parallel>], iteration_bounds = array<i64: 1>, scalar_prefetch = 0 : i64, scratch_operands = 0 : i64, tpu.core_type = #tpu.core_type<tc>, window_params = [{transform_indices = @transform_0, window_bounds = array<i64: 128, 128>}, {transform_indices = @transform_1, window_bounds = array<i64: 128, 1>}, {pipeline_mode = #tpu.pipeline_mode<synchronous>, transform_indices = @transform_2, window_bounds = array<i64: 128, 128>}, {pipeline_mode = #tpu.pipeline_mode<synchronous>, transform_indices = @transform_3, window_bounds = array<i64: 128, 128>}, {pipeline_mode = #tpu.pipeline_mode<synchronous>, transform_indices = @transform_4, window_bounds = array<i64: 1, 128>}, {pipeline_mode = #tpu.pipeline_mode<synchronous>, transform_indices = @transform_5, window_bounds = array<i64: 128, 128>}, {pipeline_mode = #tpu.pipeline_mode<synchronous>, transform_indices = @transform_6, window_bounds = array<i64: 1, 128>}, {transform_indices = @transform_7, window_bounds = array<i64: 128, 128>}]} {
    %c0 = arith.constant 0 : index
    %c0_0 = arith.constant 0 : index
    %0 = vector.load %arg1[%c0, %c0_0] : memref<128x128xbf16, #tpu.memory_space<vmem>>, vector<128x128xbf16>
    %c0_1 = arith.constant 0 : index
    %c0_2 = arith.constant 0 : index
    %1 = vector.load %arg3[%c0_1, %c0_2] : memref<128x128xbf16, #tpu.memory_space<vmem>>, vector<128x128xbf16>
    %cst = arith.constant dense<0.000000e+00> : vector<128x128xf32>
    %2 = tpu.matmul %0, %1, %cst {dimension_numbers = #tpu.dot_dimension_numbers<[1], [0], [0], [1], [0, 0, 1, 1], [], []>} : vector<128x128xbf16>, vector<128x128xbf16>, vector<128x128xf32> -> vector<128x128xf32>
    %c0_3 = arith.constant 0 : index
    %c0_4 = arith.constant 0 : index
    %3 = vector.load %arg2[%c0_3, %c0_4] : memref<128x1xf32, #tpu.memory_space<vmem>>, vector<128x1xf32>
    %4 = vector.broadcast %3 : vector<128x1xf32> to vector<128x128xf32>
    %5 = arith.mulf %2, %4 : vector<128x128xf32>
    %6 = arith.truncf %5 : vector<128x128xf32> to vector<128x128xbf16>
    %c0_5 = arith.constant 0 : index
    %c0_6 = arith.constant 0 : index
    %7 = vector.load %arg4[%c0_5, %c0_6] : memref<128x128xbf16, #tpu.memory_space<vmem>>, vector<128x128xbf16>
    %cst_7 = arith.constant dense<0.000000e+00> : vector<128x128xf32>
    %8 = tpu.matmul %6, %7, %cst_7 {dimension_numbers = #tpu.dot_dimension_numbers<[1], [0], [0], [1], [0, 0, 1, 1], [], []>} : vector<128x128xbf16>, vector<128x128xbf16>, vector<128x128xf32> -> vector<128x128xf32>
    %c0_8 = arith.constant 0 : index
    %c0_9 = arith.constant 0 : index
    %9 = vector.load %arg5[%c0_8, %c0_9] : memref<1x128xf32, #tpu.memory_space<vmem>>, vector<1x128xf32>
    %10 = vector.broadcast %9 : vector<1x128xf32> to vector<128x128xf32>
    %11 = arith.addf %8, %10 : vector<128x128xf32>
    %cst_10 = arith.constant 0.000000e+00 : f32
    %12 = vector.broadcast %cst_10 : f32 to vector<128x128xf32>
    %13 = arith.maximumf %11, %12 : vector<128x128xf32>
    %14 = arith.truncf %13 : vector<128x128xf32> to vector<128x128xbf16>
    %c0_11 = arith.constant 0 : index
    %c0_12 = arith.constant 0 : index
    %15 = vector.load %arg6[%c0_11, %c0_12] : memref<128x128xbf16, #tpu.memory_space<vmem>>, vector<128x128xbf16>
    %cst_13 = arith.constant dense<0.000000e+00> : vector<128x128xf32>
    %16 = tpu.matmul %14, %15, %cst_13 {dimension_numbers = #tpu.dot_dimension_numbers<[1], [0], [0], [1], [0, 0, 1, 1], [], []>} : vector<128x128xbf16>, vector<128x128xbf16>, vector<128x128xf32> -> vector<128x128xf32>
    %c0_14 = arith.constant 0 : index
    %c0_15 = arith.constant 0 : index
    %17 = vector.load %arg7[%c0_14, %c0_15] : memref<1x128xf32, #tpu.memory_space<vmem>>, vector<1x128xf32>
    %18 = vector.broadcast %17 : vector<1x128xf32> to vector<128x128xf32>
    %19 = arith.addf %16, %18 : vector<128x128xf32>
    %c0_16 = arith.constant 0 : index
    %c0_17 = arith.constant 0 : index
    %20 = vector.load %arg8[%c0_16, %c0_17] : memref<128x128xf32, #tpu.memory_space<vmem>>, vector<128x128xf32>
    tpu.vector_store %arg8[%c0_16, %c0_17], %19 {strides = array<i32>} : memref<128x128xf32, #tpu.memory_space<vmem>>, vector<128x128xf32>,
    return
  }
  func.func @transform_0(%arg0: i32) -> (i32, i32) {
    %c0_i32 = arith.constant 0 : i32
    %c0_i32_0 = arith.constant 0 : i32
    return %arg0, %c0_i32 : i32, i32
  }
  func.func @transform_1(%arg0: i32) -> (i32, i32) {
    %c0_i32 = arith.constant 0 : i32
    %c0_i32_0 = arith.constant 0 : i32
    return %arg0, %c0_i32 : i32, i32
  }
  func.func @transform_2(%arg0: i32) -> (i32, i32) {
    %c0_i32 = arith.constant 0 : i32
    %c0_i32_0 = arith.constant 0 : i32
    %c0_i32_1 = arith.constant 0 : i32
    return %c0_i32, %c0_i32_0 : i32, i32
  }
  func.func @transform_3(%arg0: i32) -> (i32, i32) {
    %c0_i32 = arith.constant 0 : i32
    %c0_i32_0 = arith.constant 0 : i32
    %c0_i32_1 = arith.constant 0 : i32
    return %c0_i32, %c0_i32_0 : i32, i32
  }
  func.func @transform_4(%arg0: i32) -> (i32, i32) {
    %c0_i32 = arith.constant 0 : i32
    %c0_i32_0 = arith.constant 0 : i32
    %c0_i32_1 = arith.constant 0 : i32
    return %c0_i32, %c0_i32_0 : i32, i32
  }
  func.func @transform_5(%arg0: i32) -> (i32, i32) {
    %c0_i32 = arith.constant 0 : i32
    %c0_i32_0 = arith.constant 0 : i32
    %c0_i32_1 = arith.constant 0 : i32
    return %c0_i32, %c0_i32_0 : i32, i32
  }
  func.func @transform_6(%arg0: i32) -> (i32, i32) {
    %c0_i32 = arith.constant 0 : i32
    %c0_i32_0 = arith.constant 0 : i32
    %c0_i32_1 = arith.constant 0 : i32
    return %c0_i32, %c0_i32_0 : i32, i32
  }
  func.func @transform_7(%arg0: i32) -> (i32, i32) {
    %c0_i32 = arith.constant 0 : i32
    %c0_i32_0 = arith.constant 0 : i32
    return %arg0, %c0_i32 : i32, i32
  }
}

</mosaic_0001>

<bundles_post_ra>
// kernel: dan_forward.1
= control target key start
LH: loop header
LB: loop body
LE: loop exit
PB: predicated region body
PF: predicated region fallthrough
CT: control target
= control target key end

     0   :  { %v981_v1 = vmov 0   ;;  %s1238_s2 = inlined_call_operand.vmem [shape: bf16[128,128], index: 2, kind: input, shape index: {}]   ;;  %s1239_s0 = inlined_call_operand.vmem [shape: bf16[128,128], index: 0, kind: input, shape index: {}]   ;;  %s1240_s1 = inlined_call_operand.vmem [shape: f32[128,1], index: 1, kind: input, shape index: {}]   ;;  %s1241_s3 = inlined_call_operand.vmem [shape: bf16[128,128], index: 3, kind: input, shape index: {}]   ;;  %s1242_s5 = inlined_call_operand.vmem [shape: bf16[128,128], index: 5, kind: input, shape index: {}]   ;;  %s1243_s4 = inlined_call_operand.vmem [shape: f32[1,128], index: 4, kind: input, shape index: {}]   ;;  %s1244_s6 = inlined_call_operand.vmem [shape: f32[1,128], index: 6, kind: input, shape index: {}]   ;;  %s1245_s7 = inlined_call_operand.vmem [shape: f32[128,128], index: 7, kind: output, shape index: {}]  }
   0x1   :  { %v949_v0 = vld [vmem:[%s1238_s2] sm:$0xff]   ;;  %947 = vset.pattern.permute.xlu0 %v981_v1  ;;  %948 = vset.pattern.permute.xlu1 %v981_v1  ;;  %v950_v2 = vld [vmem:[%s1238_s2 + $0x8] sm:$0xff]   ;;  %v951_v3 = vld [vmem:[%s1238_s2 + $0x10] sm:$0xff]  }
   0x2   :  { %834 = vmatprep.subr.bf16.mxu0 %v949_v0  ;;  %v952_v4 = vld [vmem:[%s1238_s2 + $0x18] sm:$0xff]   ;;  %v957_v5 = vld [vmem:[%s1239_s0] sm:$0xff]   ;;  %v954_v7 = vld [vmem:[%s1238_s2 + $0x28] sm:$0xff]  }
   0x3   :  { %835 = vmatpush3.bf16.msra.mxu0 %v949_v0  ;;  %850 = vmatprep.mubr.bf16.mxu0 %v957_v5  ;;  %v953_v6 = vld [vmem:[%s1238_s2 + $0x20] sm:$0xff]   ;;  %v254_v9 = vld [vmem:[%s1240_s1 + $0x10] sm:$0xff]  ;;  %v253_v10 = vld [vmem:[%s1240_s1 + $0x8] sm:$0xff] }
   0x4   :  { %836 = vmatprep.subr.bf16.mxu0 %v950_v2  ;;  %v252_v8 = vld [vmem:[%s1240_s1] sm:$0xff]  ;;  %280 = vperm.xlu1 %948, %v254_v9   ;;  %v255_v11 = vld [vmem:[%s1240_s1 + $0x18] sm:$0xff]  ;;  %v955_v12 = vld [vmem:[%s1238_s2 + $0x30] sm:$0xff]  }
   0x5   :  { %270 = vperm.xlu0 %947, %v252_v8   ;;  %v256_v13 = vld [vmem:[%s1240_s1 + $0x20] sm:$0xff]  ;;  %v257_v14 = vld [vmem:[%s1240_s1 + $0x28] sm:$0xff]  ;;  %v956_v15 = vld [vmem:[%s1238_s2 + $0x38] sm:$0xff]  }
   0x6   :  { %v965_v16 = vld [vmem:[%s1241_s3] sm:$0xff]   ;;  %v258_v17 = vld [vmem:[%s1240_s1 + $0x30] sm:$0xff]  ;;  %v259_v18 = vld [vmem:[%s1240_s1 + $0x38] sm:$0xff] }
   0x7   :  { %837 = vmatpush3.bf16.msra.mxu0 %v950_v2  ;;  %866 = vmatprep.subr.bf16.mxu1 %v965_v16  ;;  %v966_v19 = vld [vmem:[%s1241_s3 + $0x8] sm:$0xff]   ;;  %v967_v20 = vld [vmem:[%s1241_s3 + $0x10] sm:$0xff]   ;;  %v260_v22 = vld [vmem:[%s1240_s1 + $0x40] sm:$0xff] }
   0x8   :  { %838 = vmatprep.subr.bf16.mxu0 %v951_v3  ;;  %285 = vperm.xlu1 %948, %v255_v11   ;;  %v958_v21 = vld [vmem:[%s1239_s0 + $0x8] sm:$0xff]   ;;  %v959_v24 = vld [vmem:[%s1239_s0 + $0x10] sm:$0xff]   ;;  %v968_v25 = vld [vmem:[%s1241_s3 + $0x18] sm:$0xff]  }
   0x9   :  { %275 = vperm.xlu0 %947, %v253_v10   ;;  %867 = vmatpush3.bf16.msra.mxu1 %v965_v16  ;;  %v261_v23 = vld [vmem:[%s1240_s1 + $0x48] sm:$0xff]  ;;  %v262_v26 = vld [vmem:[%s1240_s1 + $0x50] sm:$0xff]  ;;  %v263_v27 = vld [vmem:[%s1240_s1 + $0x58] sm:$0xff] }
   0xa   :  { %868 = vmatprep.subr.bf16.mxu1 %v966_v19  ;;  %v969_v28 = vld [vmem:[%s1241_s3 + $0x20] sm:$0xff]   ;;  %v960_v29 = vld [vmem:[%s1239_s0 + $0x18] sm:$0xff]   ;;  %v265_v31 = vld [vmem:[%s1240_s1 + $0x68] sm:$0xff] }
   0xb   :  { %839 = vmatpush3.bf16.msra.mxu0 %v951_v3  ;;  %v264_v30 = vld [vmem:[%s1240_s1 + $0x60] sm:$0xff]  ;;  %v970_v33 = vld [vmem:[%s1241_s3 + $0x28] sm:$0xff]   ;;  %v266_v34 = vld [vmem:[%s1240_s1 + $0x70] sm:$0xff] }
   0xc   :  { %840 = vmatprep.subr.bf16.mxu0 %v952_v4  ;;  %295 = vperm.xlu1 %948, %v257_v14   ;;  %v961_v32 = vld [vmem:[%s1239_s0 + $0x20] sm:$0xff]   ;;  %v267_v35 = vld [vmem:[%s1240_s1 + $0x78] sm:$0xff]  ;;  %v962_v36 = vld [vmem:[%s1239_s0 + $0x28] sm:$0xff]  }
   0xd   :  { %290 = vperm.xlu0 %947, %v256_v13   ;;  %869 = vmatpush3.bf16.msra.mxu1 %v966_v19  ;;  %v963_v37 = vld [vmem:[%s1239_s0 + $0x30] sm:$0xff]   ;;  %v964_v38 = vld [vmem:[%s1239_s0 + $0x38] sm:$0xff]   ;;  %v973_v41 = vld [vmem:[%s1242_s5] sm:$0xff]  }
   0xe   :  { %870 = vmatprep.subr.bf16.mxu1 %v967_v20  ;;  %v971_v39 = vld [vmem:[%s1241_s3 + $0x30] sm:$0xff]   ;;  %v972_v40 = vld [vmem:[%s1241_s3 + $0x38] sm:$0xff]   ;;  %v974_v42 = vld [vmem:[%s1242_s5 + $0x8] sm:$0xff]  }
   0xf   :  { %841 = vmatpush3.bf16.msra.mxu0 %v952_v4  ;;  %v975_v43 = vld [vmem:[%s1242_s5 + $0x10] sm:$0xff]   ;;  %v1154_v44 = vld [vmem:[%s1242_s5 + $0x18] sm:$0xff]   ;;  %v1160_v45 = vld [vmem:[%s1242_s5 + $0x20] sm:$0xff]  }
  0x10   :  { %842 = vmatprep.subr.bf16.mxu0 %v953_v6  ;;  %305 = vperm.xlu1 %948, %v259_v18   ;;  %v1167_v46 = vld [vmem:[%s1242_s5 + $0x28] sm:$0xff]  }
  0x11   :  { %300 = vperm.xlu0 %947, %v258_v17   ;;  %871 = vmatpush3.bf16.msra.mxu1 %v967_v20 }
  0x12   :  { %872 = vmatprep.subr.bf16.mxu1 %v968_v25 }
  0x13   :  { %843 = vmatpush3.bf16.msra.mxu0 %v953_v6 }
  0x14   :  { %844 = vmatprep.subr.bf16.mxu0 %v954_v7  ;;  %315 = vperm.xlu1 %948, %v261_v23  }
  0x15   :  { %310 = vperm.xlu0 %947, %v260_v22   ;;  %873 = vmatpush3.bf16.msra.mxu1 %v968_v25 }
  0x16   :  { %874 = vmatprep.subr.bf16.mxu1 %v969_v28 }
  0x17   :  { %845 = vmatpush3.bf16.msra.mxu0 %v954_v7 }
  0x18   :  { %846 = vmatprep.subr.bf16.mxu0 %v955_v12  ;;  %325 = vperm.xlu1 %948, %v263_v27  }
  0x19   :  { %320 = vperm.xlu0 %947, %v262_v26   ;;  %875 = vmatpush3.bf16.msra.mxu1 %v969_v28 }
  0x1a   :  { %876 = vmatprep.subr.bf16.mxu1 %v970_v33 }
  0x1b   :  { %847 = vmatpush3.bf16.msra.mxu0 %v955_v12 }
  0x1c   :  { %848 = vmatprep.subr.bf16.mxu0 %v956_v15  ;;  %335 = vperm.xlu1 %948, %v265_v31  }
  0x1d   :  { %330 = vperm.xlu0 %947, %v264_v30   ;;  %877 = vmatpush3.bf16.msra.mxu1 %v970_v33 }
  0x1e   :  { %878 = vmatprep.subr.bf16.mxu1 %v971_v39 }
  0x1f   :  { %849 = vmatpush3.bf16.msra.mxu0 %v956_v15 }
  0x20   :  { %345 = vperm.xlu1 %948, %v267_v35   ;;  %898 = vmatprep.subr.bf16.mxu0 %v973_v41 }
  0x21   :  { %340 = vperm.xlu0 %947, %v266_v34   ;;  %879 = vmatpush3.bf16.msra.mxu1 %v971_v39  ;;  %v979_v39 = vld [vmem:[%s1242_s5 + $0x30] sm:$0xff]  }
  0x22   :  { %851 = vmatmul.mubr.bf16.vlgmr.msra.gmra.mrb[0].mxu0 %v958_v21  ;;  %880 = vmatprep.subr.bf16.mxu1 %v972_v40 }
  0x23   :  { %854 = vmatprep.mubr.bf16.mxu0 %v959_v24  ;;  %899 = vmatpush3.bf16.msra.mxu0 %v973_v41 }
  0x24   :  { %900 = vmatprep.subr.bf16.mxu0 %v974_v42 }
  0x25   :  { %881 = vmatpush3.bf16.msra.mxu1 %v972_v40  ;;  %v980_v40 = vld [vmem:[%s1242_s5 + $0x38] sm:$0xff]  }
  0x26   :  { %930 = vmatprep.subr.bf16.mxu1 %v973_v41 }
  0x27   :  { %901 = vmatpush3.bf16.msra.mxu0 %v974_v42 }
  0x28   :  { %902 = vmatprep.subr.bf16.mxu0 %v975_v43 }
  0x2a   :  { %855 = vmatmul.mubr.bf16.gmra.mrb[4].mxu0 %v960_v29 }
  0x2b   :  { %858 = vmatprep.mubr.bf16.mxu0 %v961_v32  ;;  %903 = vmatpush3.bf16.msra.mxu0 %v975_v43 }
  0x2c   :  { %904 = vmatprep.subr.bf16.mxu0 %v1154_v44 }
  0x2f   :  { %905 = vmatpush3.bf16.msra.mxu0 %v1154_v44 }
  0x30   :  { %906 = vmatprep.subr.bf16.mxu0 %v1160_v45 }
  0x32   :  { %859 = vmatmul.mubr.bf16.gmra.mrb[8].mxu0 %v962_v36 }
  0x33   :  { %862 = vmatprep.mubr.bf16.mxu0 %v963_v37  ;;  %907 = vmatpush3.bf16.msra.mxu0 %v1160_v45 }
  0x34   :  { %908 = vmatprep.subr.bf16.mxu0 %v1167_v46 }
  0x37   :  { %909 = vmatpush3.bf16.msra.mxu0 %v1167_v46 }
  0x38   :  { %910 = vmatprep.subr.bf16.mxu0 %v979_v39 }
  0x3a   :  { %863 = vmatmul.mubr.bf16.gmra.mrb[12].mxu0 %v964_v38 }
  0x3b   :  { %911 = vmatpush3.bf16.msra.mxu0 %v979_v39 }
  0x3c   :  { %912 = vmatprep.subr.bf16.mxu0 %v980_v40 }
  0x3f   :  { %913 = vmatpush3.bf16.msra.mxu0 %v980_v40 }
  0x83   :  { %v281_v48 = vpop.permute.xlu1 %280 }
  0x84   :  { %v271_v47 = vpop.permute.xlu0 %270 }
  0x87   :  { %v286_v50 = vpop.permute.xlu1 %285 }
  0x88   :  { %v276_v49 = vpop.permute.xlu0 %275 }
  0x8b   :  { %v296_v52 = vpop.permute.xlu1 %295 }
  0x8c   :  { %v291_v51 = vpop.permute.xlu0 %290 }
  0x8f   :  { %v306_v56 = vpop.permute.xlu1 %305 }
  0x90   :  { %v301_v54 = vpop.permute.xlu0 %300 }
  0x93   :  { %v316_v2 = vpop.permute.xlu1 %315 }
  0x94   :  { %v311_v1 = vpop.permute.xlu0 %310 }
  0x97   :  { %v326_v13 = vpop.permute.xlu1 %325 }
  0x98   :  { %v321_v11 = vpop.permute.xlu0 %320 }
  0x9b   :  { %v336_v22 = vpop.permute.xlu1 %335 }
  0x9c   :  { %v331_v18 = vpop.permute.xlu0 %330 }
  0x9f   :  { %v346_v30 = vpop.permute.xlu1 %345 }
  0xa0   :  { %v341_v28 = vpop.permute.xlu0 %340 }
  0xf5   :  { %v852_v53 = vpop.f32.mrb[0].mxu0 }
  0xf6   :  { %v189_v55 = vpop.f32.mrb[1].mxu0  ;;  %v350_v58 = vmul.f32 %v852_v53, %v281_v48 }
  0xf7   :  { %v853_v57 = vpop.f32.mrb[2].mxu0  ;;  %v348_v61 = vmul.f32 %v271_v47, %v189_v55 }
  0xf8   :  { %v351_v59 = vmul.f32 %v853_v57, %v286_v50  ;;  %v192_v60 = vpop.f32.mrb[3].mxu0 }
  0xf9   :  { %v349_v62 = vmul.f32 %v276_v49, %v192_v60 }
  0xfa   :  { %v365_v63 = vpack.c.bf16 %v351_v59, %v350_v58 }
  0xfb   :  { %v364_v0 = vpack.c.bf16 %v349_v62, %v348_v61 }
  0xfd   :  { %v856_v3 = vpop.f32.mrb[4].mxu0  ;;  %882 = vmatprep.mubr.bf16.mxu1 %v364_v0 }
  0xfe   :  { %v205_v4 = vpop.f32.mrb[5].mxu0  ;;  %883 = vmatmul.mubr.bf16.vlgmr.msra.gmra.mrb[0].mxu1 %v365_v63  ;;  %v354_v6 = vmul.f32 %v856_v3, %v301_v54 }
  0xff   :  { %v857_v5 = vpop.f32.mrb[6].mxu0  ;;  %938 = vmatpush3.bf16.msra.mxu1 %v973_v41  ;;  %v352_v9 = vmul.f32 %v291_v51, %v205_v4  ;;  %v768_v41 = vld [vmem:[%s1243_s4] ss:$0 sm:$0xff] }
 0x100   :  { %v355_v7 = vmul.f32 %v857_v5, %v306_v56  ;;  %v208_v8 = vpop.f32.mrb[7].mxu0  ;;  %931 = vmatprep.subr.bf16.mxu1 %v974_v42 }
 0x101   :  { %v353_v10 = vmul.f32 %v296_v52, %v208_v8 }
 0x102   :  { %v367_v12 = vpack.c.bf16 %v355_v7, %v354_v6 }
 0x103   :  { %v366_v14 = vpack.c.bf16 %v353_v10, %v352_v9  ;;  %939 = vmatpush3.bf16.msra.mxu1 %v974_v42 }
 0x104   :  { %932 = vmatprep.subr.bf16.mxu1 %v975_v43 }
 0x105   :  { %v860_v15 = vpop.f32.mrb[8].mxu0  ;;  %886 = vmatprep.mubr.bf16.mxu1 %v366_v14 }
 0x106   :  { %v221_v16 = vpop.f32.mrb[9].mxu0  ;;  %887 = vmatmul.mubr.bf16.gmra.mrb[4].mxu1 %v367_v12  ;;  %v358_v19 = vmul.f32 %v860_v15, %v321_v11 }
 0x107   :  { %v861_v17 = vpop.f32.mrb[10].mxu0  ;;  %940 = vmatpush3.bf16.msra.mxu1 %v975_v43  ;;  %v356_v23 = vmul.f32 %v311_v1, %v221_v16 }
 0x108   :  { %v359_v20 = vmul.f32 %v861_v17, %v326_v13  ;;  %v224_v21 = vpop.f32.mrb[11].mxu0  ;;  %933 = vmatprep.subr.bf16.mxu1 %v1154_v44 }
 0x109   :  { %v357_v24 = vmul.f32 %v316_v2, %v224_v21 }
 0x10a   :  { %v369_v25 = vpack.c.bf16 %v359_v20, %v358_v19 }
 0x10b   :  { %v368_v26 = vpack.c.bf16 %v357_v24, %v356_v23  ;;  %941 = vmatpush3.bf16.msra.mxu1 %v1154_v44 }
 0x10c   :  { %934 = vmatprep.subr.bf16.mxu1 %v1160_v45 }
 0x10d   :  { %v864_v27 = vpop.f32.mrb[12].mxu0  ;;  %890 = vmatprep.mubr.bf16.mxu1 %v368_v26 }
 0x10e   :  { %v237_v29 = vpop.f32.mrb[13].mxu0  ;;  %891 = vmatmul.mubr.bf16.gmra.mrb[8].mxu1 %v369_v25  ;;  %v362_v32 = vmul.f32 %v864_v27, %v341_v28 }
 0x10f   :  { %v865_v31 = vpop.f32.mrb[14].mxu0  ;;  %942 = vmatpush3.bf16.msra.mxu1 %v1160_v45  ;;  %v360_v35 = vmul.f32 %v331_v18, %v237_v29 }
 0x110   :  { %v363_v33 = vmul.f32 %v865_v31, %v346_v30  ;;  %v240_v34 = vpop.f32.mrb[15].mxu0  ;;  %935 = vmatprep.subr.bf16.mxu1 %v1167_v46 }
 0x111   :  { %v361_v36 = vmul.f32 %v336_v22, %v240_v34  ;;  %v777_v34 = vld [vmem:[%s1244_s6] ss:$0 sm:$0xff] }
 0x112   :  { %v371_v37 = vpack.c.bf16 %v363_v33, %v362_v32 }
 0x113   :  { %v370_v38 = vpack.c.bf16 %v361_v36, %v360_v35  ;;  %943 = vmatpush3.bf16.msra.mxu1 %v1167_v46 }
 0x114   :  { %936 = vmatprep.subr.bf16.mxu1 %v979_v39 }
 0x115   :  { %894 = vmatprep.mubr.bf16.mxu1 %v370_v38 }
 0x116   :  { %895 = vmatmul.mubr.bf16.gmra.mrb[12].mxu1 %v371_v37 }
 0x117   :  { %944 = vmatpush3.bf16.msra.mxu1 %v979_v39 }
 0x118   :  { %937 = vmatprep.subr.bf16.mxu1 %v980_v40 }
 0x11b   :  { %945 = vmatpush3.bf16.msra.mxu1 %v980_v40 }
 0x1d1   :  { %v884_v42 = vpop.f32.mrb[0].mxu1 }
 0x1d2   :  { %v486_v43 = vadd.f32 %v884_v42, %v768_v41  ;;  %v477_v44 = vpop.f32.mrb[1].mxu1 }
 0x1d3   :  { %v478_v45 = vadd.f32 %v768_v41, %v477_v44  ;;  %v885_v46 = vpop.f32.mrb[2].mxu1 }
 0x1d4   :  { %v489_v47 = vadd.f32 %v885_v46, %v768_v41  ;;  %v480_v48 = vpop.f32.mrb[3].mxu1  ;;  %v542_v50 = vmax.f32 %v486_v43, 0.0 }
 0x1d5   :  { %v481_v49 = vadd.f32 %v768_v41, %v480_v48  ;;  %v540_v52 = vmax.f32 %v478_v45, 0.0 }
 0x1d6   :  { %v543_v51 = vmax.f32 %v489_v47, 0.0 }
 0x1d7   :  { %v541_v53 = vmax.f32 %v481_v49, 0.0 }
 0x1d8   :  { %v557_v54 = vpack.c.bf16 %v543_v51, %v542_v50 }
 0x1d9   :  { %v556_v55 = vpack.c.bf16 %v541_v53, %v540_v52  ;;  %v888_v56 = vpop.f32.mrb[4].mxu1 }
 0x1da   :  { %v502_v57 = vadd.f32 %v888_v56, %v768_v41  ;;  %v493_v58 = vpop.f32.mrb[5].mxu1 }
 0x1db   :  { %v494_v59 = vadd.f32 %v768_v41, %v493_v58  ;;  %v889_v60 = vpop.f32.mrb[6].mxu1  ;;  %914 = vmatprep.mubr.bf16.mxu0 %v556_v55 }
 0x1dc   :  { %v505_v61 = vadd.f32 %v889_v60, %v768_v41  ;;  %v496_v62 = vpop.f32.mrb[7].mxu1  ;;  %915 = vmatmul.mubr.bf16.vlgmr.msra.gmra.mrb[16].mxu0 %v557_v54  ;;  %v546_v0 = vmax.f32 %v502_v57, 0.0 }
 0x1dd   :  { %v497_v63 = vadd.f32 %v768_v41, %v496_v62  ;;  %v544_v2 = vmax.f32 %v494_v59, 0.0 }
 0x1de   :  { %v547_v1 = vmax.f32 %v505_v61, 0.0 }
 0x1df   :  { %v545_v3 = vmax.f32 %v497_v63, 0.0 }
 0x1e0   :  { %v559_v4 = vpack.c.bf16 %v547_v1, %v546_v0 }
 0x1e1   :  { %v558_v5 = vpack.c.bf16 %v545_v3, %v544_v2  ;;  %v892_v6 = vpop.f32.mrb[8].mxu1 }
 0x1e2   :  { %v518_v7 = vadd.f32 %v892_v6, %v768_v41  ;;  %v509_v8 = vpop.f32.mrb[9].mxu1 }
 0x1e3   :  { %v510_v9 = vadd.f32 %v768_v41, %v509_v8  ;;  %v893_v10 = vpop.f32.mrb[10].mxu1  ;;  %918 = vmatprep.mubr.bf16.mxu0 %v558_v5 }
 0x1e4   :  { %v521_v11 = vadd.f32 %v893_v10, %v768_v41  ;;  %v512_v12 = vpop.f32.mrb[11].mxu1  ;;  %919 = vmatmul.mubr.bf16.gmra.mrb[20].mxu0 %v559_v4  ;;  %v550_v14 = vmax.f32 %v518_v7, 0.0 }
 0x1e5   :  { %v513_v13 = vadd.f32 %v768_v41, %v512_v12  ;;  %v548_v16 = vmax.f32 %v510_v9, 0.0 }
 0x1e6   :  { %v551_v15 = vmax.f32 %v521_v11, 0.0 }
 0x1e7   :  { %v549_v17 = vmax.f32 %v513_v13, 0.0 }
 0x1e8   :  { %v561_v18 = vpack.c.bf16 %v551_v15, %v550_v14 }
 0x1e9   :  { %v560_v19 = vpack.c.bf16 %v549_v17, %v548_v16  ;;  %v896_v20 = vpop.f32.mrb[12].mxu1 }
 0x1ea   :  { %v534_v21 = vadd.f32 %v896_v20, %v768_v41  ;;  %v525_v22 = vpop.f32.mrb[13].mxu1 }
 0x1eb   :  { %v526_v23 = vadd.f32 %v768_v41, %v525_v22  ;;  %v897_v24 = vpop.f32.mrb[14].mxu1  ;;  %922 = vmatprep.mubr.bf16.mxu1 %v560_v19 }
 0x1ec   :  { %v537_v25 = vadd.f32 %v897_v24, %v768_v41  ;;  %v528_v26 = vpop.f32.mrb[15].mxu1  ;;  %923 = vmatmul.mubr.bf16.vlgmr.msra.gmra.mrb[16].mxu1 %v561_v18  ;;  %v554_v28 = vmax.f32 %v534_v21, 0.0 }
 0x1ed   :  { %v529_v27 = vadd.f32 %v768_v41, %v528_v26  ;;  %v552_v30 = vmax.f32 %v526_v23, 0.0 }
 0x1ee   :  { %v555_v29 = vmax.f32 %v537_v25, 0.0 }
 0x1ef   :  { %v553_v31 = vmax.f32 %v529_v27, 0.0 }
 0x1f0   :  { %v563_v32 = vpack.c.bf16 %v555_v29, %v554_v28 }
 0x1f1   :  { %v562_v33 = vpack.c.bf16 %v553_v31, %v552_v30 }
 0x1f3   :  { %926 = vmatprep.mubr.bf16.mxu1 %v562_v33 }
 0x1f4   :  { %927 = vmatmul.mubr.bf16.gmra.mrb[20].mxu1 %v563_v32 }
 0x2af   :  { %v916_v35 = vpop.f32.mrb[16].mxu0 }
 0x2b0   :  { %v678_v36 = vadd.f32 %v916_v35, %v777_v34  ;;  %v669_v37 = vpop.f32.mrb[17].mxu0 }
 0x2b1   :  { %v670_v38 = vadd.f32 %v777_v34, %v669_v37  ;;  %v917_v39 = vpop.f32.mrb[18].mxu0 }
 0x2b2   :  { %734 = vst [vmem:[%s1245_s7 + $0x10] sm:$0xff] %v678_v36  ;;  %v681_v40 = vadd.f32 %v917_v39, %v777_v34  ;;  %v672_v41 = vpop.f32.mrb[19].mxu0 }
 0x2b3   :  { %732 = vst [vmem:[%s1245_s7] sm:$0xff] %v670_v38  ;;  %v673_v42 = vadd.f32 %v777_v34, %v672_v41 }
 0x2b4   :  { %735 = vst [vmem:[%s1245_s7 + $0x18] sm:$0xff] %v681_v40 }
 0x2b5   :  { %733 = vst [vmem:[%s1245_s7 + $0x8] sm:$0xff] %v673_v42 }
 0x2b7   :  { %v920_v43 = vpop.f32.mrb[20].mxu0 }
 0x2b8   :  { %v694_v44 = vadd.f32 %v920_v43, %v777_v34  ;;  %v685_v45 = vpop.f32.mrb[21].mxu0 }
 0x2b9   :  { %v686_v46 = vadd.f32 %v777_v34, %v685_v45  ;;  %v921_v47 = vpop.f32.mrb[22].mxu0 }
 0x2ba   :  { %738 = vst [vmem:[%s1245_s7 + $0x30] sm:$0xff] %v694_v44  ;;  %v697_v48 = vadd.f32 %v921_v47, %v777_v34  ;;  %v688_v49 = vpop.f32.mrb[23].mxu0 }
 0x2bb   :  { %736 = vst [vmem:[%s1245_s7 + $0x20] sm:$0xff] %v686_v46  ;;  %v689_v50 = vadd.f32 %v777_v34, %v688_v49 }
 0x2bc   :  { %739 = vst [vmem:[%s1245_s7 + $0x38] sm:$0xff] %v697_v48 }
 0x2bd   :  { %737 = vst [vmem:[%s1245_s7 + $0x28] sm:$0xff] %v689_v50 }
 0x2bf   :  { %v924_v51 = vpop.f32.mrb[16].mxu1 }
 0x2c0   :  { %v710_v52 = vadd.f32 %v924_v51, %v777_v34  ;;  %v701_v53 = vpop.f32.mrb[17].mxu1 }
 0x2c1   :  { %v702_v54 = vadd.f32 %v777_v34, %v701_v53  ;;  %v925_v55 = vpop.f32.mrb[18].mxu1 }
 0x2c2   :  { %742 = vst [vmem:[%s1245_s7 + $0x50] sm:$0xff] %v710_v52  ;;  %v713_v56 = vadd.f32 %v925_v55, %v777_v34  ;;  %v704_v57 = vpop.f32.mrb[19].mxu1 }
 0x2c3   :  { %740 = vst [vmem:[%s1245_s7 + $0x40] sm:$0xff] %v702_v54  ;;  %v705_v58 = vadd.f32 %v777_v34, %v704_v57 }
 0x2c4   :  { %743 = vst [vmem:[%s1245_s7 + $0x58] sm:$0xff] %v713_v56 }
 0x2c5   :  { %741 = vst [vmem:[%s1245_s7 + $0x48] sm:$0xff] %v705_v58 }
 0x2c7   :  { %v928_v59 = vpop.f32.mrb[20].mxu1 }
 0x2c8   :  { %v726_v60 = vadd.f32 %v928_v59, %v777_v34  ;;  %v717_v61 = vpop.f32.mrb[21].mxu1 }
 0x2c9   :  { %v718_v62 = vadd.f32 %v777_v34, %v717_v61  ;;  %v929_v63 = vpop.f32.mrb[22].mxu1 }
 0x2ca   :  { %746 = vst [vmem:[%s1245_s7 + $0x70] sm:$0xff] %v726_v60  ;;  %v729_v0 = vadd.f32 %v929_v63, %v777_v34  ;;  %v720_v1 = vpop.f32.mrb[23].mxu1 }
 0x2cb   :  { %744 = vst [vmem:[%s1245_s7 + $0x60] sm:$0xff] %v718_v62  ;;  %v721_v2 = vadd.f32 %v777_v34, %v720_v1 }
 0x2cc   :  { %747 = vst [vmem:[%s1245_s7 + $0x78] sm:$0xff] %v729_v0 }
 0x2cd   :  { %745 = vst [vmem:[%s1245_s7 + $0x68] sm:$0xff] %v721_v2 }

</bundles_post_ra>
